<compile_context>
chip_gen: v7x
topology: tpu7x:2x2x1
jax: 0.10.0
libtpu: 0.0.40
codegen_flags: <defaults>
</compile_context>

<pallas_src>
import math

import jax
import jax.numpy as jnp
from jax import lax
from jax.experimental import pallas as pl
from jax.experimental.pallas import tpu as pltpu


# --------------------------------------------------------------------------
# Kernel 1: fused QKV projection
# --------------------------------------------------------------------------
def _qkv_proj_kernel(x_ref, w_ref, b_ref, o_ref):
    # x_ref: (1, tr, D) f32 | w_ref: (D, 3H) bf16 | b_ref: (1, 3H) f32
    x = x_ref[0].astype(jnp.bfloat16)
    acc = jnp.dot(x, w_ref[...], preferred_element_type=jnp.float32) + b_ref[...]
    o_ref[0] = acc.astype(o_ref.dtype)


# --------------------------------------------------------------------------
# Kernel 2: causal MHA (head-batched) + output proj + LN1 + GELU MLP + LN2
# --------------------------------------------------------------------------
def _attn_mlp_kernel(x_ref, pad_ref, q_ref, k_ref, v_ref,
                     wo_ref, bo_ref, ln1g_ref, ln1b_ref,
                     w1_ref, b1_ref, w2_ref, b2_ref, ln2g_ref, ln2b_ref,
                     o_ref):
    qi = pl.program_id(1)

    x = x_ref[0].astype(jnp.float32)          # (tq, D)   residual input
    q = q_ref[0]                              # (nh, tq, dk) bf16
    k = k_ref[0]                              # (nh, T,  dk) bf16
    v = v_ref[0]                              # (nh, T,  dk) bf16
    pad = pad_ref[0]                          # (1, T) f32, 1 = keep, 0 = masked key

    tq, dk = q.shape[1], q.shape[2]
    T = k.shape[1]

    # --- single additive mask bias: causal AND key-padding, finite (-1e30)
    #     so fully-masked rows never produce NaN (exp(-inf - -inf)).
    row = qi * tq + lax.broadcasted_iota(jnp.int32, (tq, T), 0)   # global query idx
    col = lax.broadcasted_iota(jnp.int32, (tq, T), 1)
    keep = (row >= col) & (pad > 0.0)
    bias = jnp.where(keep, 0.0, -1e30).astype(jnp.float32)        # (tq, T)

    scale = jnp.float32(1.0 / math.sqrt(dk))

    # --- head-batched attention (no per-head lane slicing / concat) ---
    s = jnp.einsum('hqd,hkd->hqk', q, k,
                   preferred_element_type=jnp.float32)            # (nh, tq, T)
    s = s * scale + bias[None, :, :]

    m = jnp.max(s, axis=-1, keepdims=True)
    p = jnp.exp(s - m)
    p = p * pl.reciprocal(jnp.sum(p, axis=-1, keepdims=True), approx=True)

    a = jnp.einsum('hqk,hkd->hqd', p.astype(jnp.bfloat16), v,
                   preferred_element_type=jnp.float32)            # (nh, tq, dk)

    # Output projection accumulated over heads: sum_h a_h @ Wo[h]  (no concat)
    mha = jnp.einsum('hqd,hdo->hqo', a.astype(jnp.bfloat16), wo_ref[...],
                     preferred_element_type=jnp.float32)          # (nh, tq, D)
    mha = jnp.sum(mha, axis=0) + bo_ref[...]                      # (tq, D)

    def layernorm(val, g, b):
        mu = jnp.mean(val, axis=-1, keepdims=True)
        var = jnp.mean((val - mu) * (val - mu), axis=-1, keepdims=True)
        return (val - mu) * lax.rsqrt(var + jnp.float32(1e-5)) * g + b

    # --- residual + LN1 ---
    h1 = layernorm(x + mha, ln1g_ref[...], ln1b_ref[...])

    # --- MLP: Linear(D,4D) -> exact GELU -> Linear(4D,D)  (f32 elementwise) ---
    u = jnp.dot(h1.astype(jnp.bfloat16), w1_ref[...],
                preferred_element_type=jnp.float32) + b1_ref[...]
    u = 0.5 * u * (1.0 + lax.erf(u * jnp.float32(1.0 / math.sqrt(2.0))))
    f = jnp.dot(u.astype(jnp.bfloat16), w2_ref[...],
                preferred_element_type=jnp.float32) + b2_ref[...]

    # --- residual + LN2 ---
    h2 = layernorm(h1 + f, ln2g_ref[...], ln2b_ref[...])

    # final nn.Dropout is identity in eval mode
    o_ref[0] = h2.astype(o_ref.dtype)


# --------------------------------------------------------------------------
# Wrapper
# --------------------------------------------------------------------------
def transformer_block(x, pad_mask, params, *, n_heads, d_k, tq=None):
    """x: (B, T, d_model) f32.  pad_mask: (B, 1, T) f32 (1 keep / 0 mask)."""
    B, T, D = x.shape
    H = n_heads * d_k
    F = 4 * D

    (wq, bq, wk, bk, wv, bv, wo, bo,
     ln1_g, ln1_b, w1, b1, w2, b2, ln2_g, ln2_b) = params

    if tq is None:
        tq = T if T <= 128 else 128
    assert T % tq == 0 and (tq == T or tq % 8 == 0)
    nq = T // tq

    # One-time weight prep in XLA: fuse QKV, head-split Wo, cast to bf16.
    w_qkv = jnp.concatenate([wq, wk, wv], axis=1).astype(jnp.bfloat16)   # (D, 3H)
    b_qkv = jnp.concatenate([bq, bk, bv], axis=1)                        # (1, 3H) f32
    wo3 = wo.reshape(n_heads, d_k, D).astype(jnp.bfloat16)               # (nh, dk, D)
    w1b = w1.astype(jnp.bfloat16)
    w2b = w2.astype(jnp.bfloat16)

    par2 = pltpu.CompilerParams(dimension_semantics=("parallel", "parallel"))

    # ---- Kernel 1: fused QKV projection ----
    qkv = pl.pallas_call(
        _qkv_proj_kernel,
        out_shape=jax.ShapeDtypeStruct((B, T, 3 * H), jnp.bfloat16),
        grid=(B, nq),
        in_specs=[
            pl.BlockSpec((1, tq, D), lambda b, i: (b, i, 0)),
            pl.BlockSpec((D, 3 * H), lambda b, i: (0, 0)),
            pl.BlockSpec((1, 3 * H), lambda b, i: (0, 0)),
        ],
        out_specs=pl.BlockSpec((1, tq, 3 * H), lambda b, i: (b, i, 0)),
        compiler_params=par2,
    )(x, w_qkv, b_qkv)

    # Head-major re-layout in XLA (kept outside the kernels on purpose).
    qkv = qkv.reshape(B, T, 3, n_heads, d_k).transpose(2, 0, 3, 1, 4)
    q, k, v = qkv[0], qkv[1], qkv[2]          # each (B, nh, T, dk) bf16

    # ---- Kernel 2: attention + output projection + LN1 + MLP + LN2 ----
    out = pl.pallas_call(
        _attn_mlp_kernel,
        out_shape=jax.ShapeDtypeStruct((B, T, D), x.dtype),
        grid=(B, nq),
        in_specs=[
            pl.BlockSpec((1, tq, D), lambda b, i: (b, i, 0)),                # x tile
            pl.BlockSpec((1, 1, T), lambda b, i: (b, 0, 0)),                 # pad mask
            pl.BlockSpec((1, n_heads, tq, d_k), lambda b, i: (b, 0, i, 0)),  # q tile
            pl.BlockSpec((1, n_heads, T, d_k), lambda b, i: (b, 0, 0, 0)),   # k (full)
            pl.BlockSpec((1, n_heads, T, d_k), lambda b, i: (b, 0, 0, 0)),   # v (full)
            pl.BlockSpec((n_heads, d_k, D), lambda b, i: (0, 0, 0)),         # wo3
            pl.BlockSpec((1, D), lambda b, i: (0, 0)),                       # bo
            pl.BlockSpec((1, D), lambda b, i: (0, 0)),                       # ln1 gamma
            pl.BlockSpec((1, D), lambda b, i: (0, 0)),                       # ln1 beta
            pl.BlockSpec((D, F), lambda b, i: (0, 0)),                       # w1
            pl.BlockSpec((1, F), lambda b, i: (0, 0)),                       # b1
            pl.BlockSpec((F, D), lambda b, i: (0, 0)),                       # w2
            pl.BlockSpec((1, D), lambda b, i: (0, 0)),                       # b2
            pl.BlockSpec((1, D), lambda b, i: (0, 0)),                       # ln2 gamma
            pl.BlockSpec((1, D), lambda b, i: (0, 0)),                       # ln2 beta
        ],
        out_specs=pl.BlockSpec((1, tq, D), lambda b, i: (b, i, 0)),
        compiler_params=par2,
    )(x, pad_mask, q, k, v, wo3, bo,
      ln1_g, ln1_b, w1b, b1, w2b, b2, ln2_g, ln2_b)
    return out


def init_params(key, d_model, n_heads, d_k):
    H = n_heads * d_k
    F = 4 * d_model
    ks = jax.random.split(key, 8)
    s = 0.05
    wq = s * jax.random.normal(ks[0], (d_model, H), jnp.float32)
    wk = s * jax.random.normal(ks[1], (d_model, H), jnp.float32)
    wv = s * jax.random.normal(ks[2], (d_model, H), jnp.float32)
    wo = s * jax.random.normal(ks[3], (H, d_model), jnp.float32)
    w1 = s * jax.random.normal(ks[4], (d_model, F), jnp.float32)
    w2 = s * jax.random.normal(ks[5], (F, d_model), jnp.float32)
    bq = 0.01 * jax.random.normal(ks[6], (1, H), jnp.float32)
    bk = jnp.zeros((1, H), jnp.float32)
    bv = jnp.zeros((1, H), jnp.float32)
    bo = jnp.zeros((1, d_model), jnp.float32)
    b1 = 0.01 * jax.random.normal(ks[7], (1, F), jnp.float32)
    b2 = jnp.zeros((1, d_model), jnp.float32)
    ln1_g = jnp.ones((1, d_model), jnp.float32)
    ln1_b = jnp.zeros((1, d_model), jnp.float32)
    ln2_g = jnp.ones((1, d_model), jnp.float32)
    ln2_b = jnp.zeros((1, d_model), jnp.float32)
    return (wq, bq, wk, bk, wv, bv, wo, bo,
            ln1_g, ln1_b, w1, b1, w2, b2, ln2_g, ln2_b)


if __name__ == "__main__":
    B, T = 2, 16
    d_model, n_heads, d_k, max_len = 32, 4, 8, 16   # T <= max_len

    key = jax.random.PRNGKey(0)
    k_x, k_p = jax.random.split(key)
    x = jax.random.normal(k_x, (B, T, d_model), jnp.float32)
    pad_mask = jnp.ones((B, 1, T), jnp.float32)
    pad_mask = pad_mask.at[1, 0, T - 2:].set(0.0)   # a couple of padded keys
    params = init_params(k_p, d_model, n_heads, d_k)

    out = transformer_block(x, pad_mask, params, n_heads=n_heads, d_k=d_k, tq=8)
    jax.block_until_ready(out)
    assert out.shape == (B, T, d_model)
    assert bool(jnp.all(jnp.isfinite(out)))
    print("KERNEL_OK")
</pallas_src>

<mosaic_0001>
module attributes {stable_mosaic.version = 11 : i64} {
  func.func @_qkv_proj_kernel(%arg0: i32, %arg1: i32, %arg2: memref<1x8x32xf32, #tpu.memory_space<vmem>>, %arg3: memref<32x96xbf16, #tpu.memory_space<vmem>>, %arg4: memref<1x96xf32, #tpu.memory_space<vmem>>, %arg5: memref<1x8x96xbf16, #tpu.memory_space<vmem>>) attributes {dimension_semantics = [#tpu.dimension_semantics<parallel>, #tpu.dimension_semantics<parallel>], iteration_bounds = array<i64: 2, 2>, scalar_prefetch = 0 : i64, scratch_operands = 0 : i64, tpu.core_type = #tpu.core_type<tc>, window_params = [{transform_indices = @transform_0, window_bounds = array<i64: 1, 8, 32>}, {pipeline_mode = #tpu.pipeline_mode<synchronous>, transform_indices = @transform_1, window_bounds = array<i64: 32, 96>}, {pipeline_mode = #tpu.pipeline_mode<synchronous>, transform_indices = @transform_2, window_bounds = array<i64: 1, 96>}, {transform_indices = @transform_3, window_bounds = array<i64: 1, 8, 96>}]} {
    %c0 = arith.constant 0 : index
    %c0_0 = arith.constant 0 : index
    %c0_1 = arith.constant 0 : index
    %0 = vector.load %arg2[%c0, %c0_0, %c0_1] : memref<1x8x32xf32, #tpu.memory_space<vmem>>, vector<1x8x32xf32>
    %1 = vector.shape_cast %0 : vector<1x8x32xf32> to vector<8x32xf32>
    %2 = arith.truncf %1 : vector<8x32xf32> to vector<8x32xbf16>
    %c0_2 = arith.constant 0 : index
    %c0_3 = arith.constant 0 : index
    %3 = vector.load %arg3[%c0_2, %c0_3] : memref<32x96xbf16, #tpu.memory_space<vmem>>, vector<32x96xbf16>
    %cst = arith.constant dense<0.000000e+00> : vector<8x96xf32>
    %4 = tpu.matmul %2, %3, %cst {dimension_numbers = #tpu.dot_dimension_numbers<[1], [0], [0], [1], [0, 0, 1, 1], [], []>} : vector<8x32xbf16>, vector<32x96xbf16>, vector<8x96xf32> -> vector<8x96xf32>
    %c0_4 = arith.constant 0 : index
    %c0_5 = arith.constant 0 : index
    %5 = vector.load %arg4[%c0_4, %c0_5] : memref<1x96xf32, #tpu.memory_space<vmem>>, vector<1x96xf32>
    %6 = vector.broadcast %5 : vector<1x96xf32> to vector<8x96xf32>
    %7 = arith.addf %4, %6 : vector<8x96xf32>
    %8 = arith.truncf %7 : vector<8x96xf32> to vector<8x96xbf16>
    %c0_6 = arith.constant 0 : index
    %c0_7 = arith.constant 0 : index
    %c0_8 = arith.constant 0 : index
    %9 = vector.load %arg5[%c0_6, %c0_7, %c0_8] : memref<1x8x96xbf16, #tpu.memory_space<vmem>>, vector<1x8x96xbf16>
    %10 = vector.shape_cast %9 : vector<1x8x96xbf16> to vector<8x96xbf16>
    %11 = vector.shape_cast %8 : vector<8x96xbf16> to vector<1x8x96xbf16>
    tpu.vector_store %arg5[%c0_6, %c0_7, %c0_8], %11 {strides = array<i32>} : memref<1x8x96xbf16, #tpu.memory_space<vmem>>, vector<1x8x96xbf16>,
    return
  }
  func.func @transform_0(%arg0: i32, %arg1: i32) -> (i32, i32, i32) {
    %c0_i32 = arith.constant 0 : i32
    %c0_i32_0 = arith.constant 0 : i32
    return %arg0, %arg1, %c0_i32 : i32, i32, i32
  }
  func.func @transform_1(%arg0: i32, %arg1: i32) -> (i32, i32) {
    %c0_i32 = arith.constant 0 : i32
    %c0_i32_0 = arith.constant 0 : i32
    %c0_i32_1 = arith.constant 0 : i32
    return %c0_i32, %c0_i32_0 : i32, i32
  }
  func.func @transform_2(%arg0: i32, %arg1: i32) -> (i32, i32) {
    %c0_i32 = arith.constant 0 : i32
    %c0_i32_0 = arith.constant 0 : i32
    %c0_i32_1 = arith.constant 0 : i32
    return %c0_i32, %c0_i32_0 : i32, i32
  }
  func.func @transform_3(%arg0: i32, %arg1: i32) -> (i32, i32, i32) {
    %c0_i32 = arith.constant 0 : i32
    %c0_i32_0 = arith.constant 0 : i32
    return %arg0, %arg1, %c0_i32 : i32, i32, i32
  }
}

</mosaic_0001>

<bundles_post_ra>
// kernel: tpu_custom_call.1
= control target key start
LH: loop header
LB: loop body
LE: loop exit
PB: predicated region body
PF: predicated region fallthrough
CT: control target
= control target key end

     0   :  { %s961_s0 = inlined_call_operand.hbm [shape: f32[2,16,32], index: 0, kind: input, shape index: {}]   ;;  %s962_s1 = inlined_call_operand.hbm [shape: bf16[32,96], index: 1, kind: input, shape index: {}]   ;;  %s963_s2 = inlined_call_operand.vmem [shape: f32[1,96], index: 2, kind: input, shape index: {}]   ;;  %s964_s3 = inlined_call_operand.hbm [shape: bf16[2,16,96], index: 3, kind: output, shape index: {}]  }
   0x1   :  { %972 = sst [smem:[#allocation14_spill]] %s962_s1 }
   0x2   :  { %8 = vsyncpa [#allocation3], 0 }
   0x3   :  { %10 = vsyncpa [#allocation3 + $0x1], 0 }
   0x4   :  { %11 = vsyncpa [#allocation6], 0 }
   0x5   :  { %12 = vsyncpa [#allocation4], 0 }
   0x6   :  { %14 = vsyncpa [#allocation4 + $0x1], 0  ;;  %s719_s12 = smov 0   ;;  %s721_s13 = smov 0  }
   0x7   :  { %s723_s14 = smov 0   ;;  %s725_s15 = smov 0  }
   0x8   :  { %s727_s16 = smov 0   ;;  %s729_s17 = smov 0  }
   0x9   :  { %s731_s18 = smov 0   ;;  %s733_s19 = smov 0  }
   0xa LB: > { %973 = sst [smem:[#allocation11_spill]] %s662_s12  ;;  %s403_s20 = sadd.s32 4294967295, %s690_s19   ;;  %s690_s19 = sphi %s733_s19, %s20_s19   ;;  %s686_s18 = sphi %s731_s18, %s1000_s18   ;;  %s682_s17 = sphi %s729_s17, %s999_s17   ;;  %s678_s16 = sphi %s727_s16, %s998_s16   ;;  %s674_s15 = sphi %s725_s15, %s997_s15   ;;  %s670_s14 = sphi %s723_s14, %s996_s14   ;;  %s666_s13 = sphi %s721_s13, %s995_s13   ;;  %s662_s12 = sphi %s719_s12, %s994_s12  }
   0xb   : > { %s404_s21 = sadd.s32 4294967294, %s690_s19   ;;  %p54_p0 = scmp.ne.s32.totalorder %s666_s13, %s662_s12 }
   0xc   : > { %p763_p1 = scmp.eq.s32.totalorder %s403_s20, 0  ;;  %p767_p2 = scmp.eq.s32.totalorder %s403_s20, 3 }
   0xd   : > { %p128_p3 = scmp.eq.s32.totalorder %s404_s21, 3  ;;  %p405_p5 = scmp.ge.s32.totalorder %s690_s19, 1 }
   0xe   : > { %s974_s22 = scalar_select %p763_p1, 1, 0 }
   0xf   : > { %s975_s23 = scalar_select %p767_p2, 1, 0 }
  0x10   : > { %p773_p4 = por %p763_p1, %p54_p0  ;;  %p778_p6 = por %p128_p3, %p54_p0 }
  0x11   : > { %p135_p7 = scmp.lt.s32.totalorder %s690_s19, 5  ;;  %s692_s27 = smov [#allocation5]  }
  0x12   : > { %s976_s24 = scalar_select %p773_p4, 1, 0 }
  0x13   : > { %s977_s25 = scalar_select %p778_p6, 1, 0 }
  0x14   : > { %p783_p8 = pnand %p405_p5, %p135_p7  ;;  %s147_s28 = sshll.u32 %s692_s27, 4  ;;  %s148_s28 = int_to_ptr.vmem [resolvable:$true] %s147_s28 }
  0x15   : > { %978 = sst [smem:[#allocation12_spill]] %s977_s25  ;;  %s981_s1 = sld [smem:[#allocation14_spill]] }
  0x16   : > { %s979_s26 = scalar_select %p783_p8, 1, 0 }
  0x17   : > { %p443_p9 = pneg %p783_p8 }
  0x19   : > { %p791_p10 = pnand %p443_p9, %p763_p1 }
  0x1b   : > { %s530_s5 = scalar_lea.hbm %s981_s1, 256  ;;  %p532_p12 = pneg %p791_p10 }
  0x1c   : > { %p531_p11 = scmp.ne.s32.totalorder %s981_s1, %s530_s5  ;;  %p537_p3 = scmp.lt.u32.totalorder %s530_s5, %s981_s1 }
  0x1e   : > { %p533_p13 = pnand %p532_p12, %p531_p11 }
  0x20   : > { %p534_p0 = pneg %p533_p13 }
  0x22   : > { %p539_p5 = pnand %p537_p3, %p534_p0 }
  0x24   : > { %542 = shalt.err (!%p539_p5)
}
  0x25   : > { %s543_s10 = scalar_lea.vmem %s148_s28, 256  ;;  %p551_p1 = scmp.lt.s32.totalorder %s148_s28, %s148_s28 }
  0x26   : > { %p544_p7 = scmp.ne.s32.totalorder %s148_s28, %s543_s10  ;;  %p552_p4 = scmp.lt.s32.totalorder %s543_s10, %s543_s10 }
  0x28   : > { %p546_p9 = pnand %p544_p7, %p532_p12  ;;  %p553_p8 = por %p552_p4, %p551_p1 }
  0x2a   : > { %p547_p6 = pneg %p546_p9 }
  0x2c   : > { %p554_p2 = pnand %p553_p8, %p547_p6 }
  0x2e   : > { %557 = shalt.err (!%p554_p2)
}
  0x2f   : > { %s693_s11 = smov 64   ;;  %s694_s20 = smov 4  }
  0x30   : > { %446 = dma.hbm_to_vmem [thread:$0]  (!%p791_p10), %s981_s1, 256, %s148_s28, [#allocation6], %s693_s11, %s693_s11, %s694_s20  }
  0x31   : > { %s29_s30 = sadd.s32 1, %s682_s17  ;;  %s32_s4 = sadd.s32 1, %s686_s18 }
  0x32   : > { %p30_p1 = scmp.ge.s32.totalorder %s29_s30, 2  ;;  %s41_s5 = sadd.s32 1, %s670_s14 }
  0x33   : > { %p48_p2 = scmp.ne.s32.totalorder %s670_s14, %s666_s13  ;;  %p49_p4 = scmp.eq.s32.totalorder %s690_s19, 0 }
  0x34   : > { %s1002_s30 = smov (%p30_p1, %s29_s30), 0  ;;  %s1004_s4 = smov (!%p30_p1, %s32_s4), %s686_s18 }
  0x35   : > { %982 = sst [smem:[#allocation13_spill]] %s1002_s30  ;;  %s37_s6 = ssub.s32 %s682_s17, %s1002_s30 }
  0x36   : > { %p34_p6 = scmp.ge.s32.totalorder %s1004_s4, 2  ;;  %p983_p8 = scmp.ne.s32.totalorder %s975_s23, 0 }
  0x37   : > { %p828_p10 = por %p49_p4, %p48_p2  ;;  %p456_p12 = scmp.lt.s32.totalorder %s690_s19, 4 }
  0x38   : > { %p824_p11 = por %p983_p8, %p48_p2  ;;  %s1006_s4 = smov (%p34_p6, %s1004_s4), 0 }
  0x39   : > { %s164_s7 = sand.u32 1, %s670_s14   ;;  %s409_s8 = sshll.u32 %s686_s18, 1 }
  0x3a   : > { %s36_s9 = ssub.s32 %s686_s18, %s1006_s4  ;;  %s408_s11 = sshll.u32 %s164_s7, 3 }
  0x3b   : > { %s38_s10 = sor.u32 %s37_s6, %s36_s9  ;;  %s173_s23 = sadd.s32 %s682_s17, %s409_s8 }
  0x3c   : > { %p39_p13 = scmp.eq.s32.totalorder %s38_s10, 0  ;;  %s168_s20 = scalar_lea.vmem [#allocation2], %s408_s11 }
  0x3d   : > { %s177_s21 = sshll.u32 %s168_s20, 4  ;;  %s410_s1 = sshll.u32 %s173_s23, 7  ;;  %s843_s21 = int_to_ptr.vmem [resolvable:$true] %s177_s21 }
  0x3e   : > { %s841_s27 = scalar_select %p39_p13, %s670_s14, %s41_s5  }
  0x3f   : > { %s848_s12 = scalar_lea.hbm %s961_s0, %s410_s1  ;;  %p854_p0 = pnand %p456_p12, %p828_p10 }
  0x40   : > { %s165_s5 = scalar_lea.sflag [#allocation3], %s164_s7  ;;  %s558_s8 = scalar_lea.hbm %s848_s12, 128 }
  0x41   : > { %p559_p3 = scmp.ne.s32.totalorder %s848_s12, %s558_s8  ;;  %p560_p5 = pneg %p854_p0 }
  0x42   : > { %s563_s30 = scalar_lea.hbm %s961_s0, 512  ;;  %p564_p1 = scmp.lt.u32.totalorder %s848_s12, %s961_s0 }
  0x43   : > { %p561_p7 = pnand %p560_p5, %p559_p3  ;;  %p565_p2 = scmp.lt.u32.totalorder %s563_s30, %s558_s8 }
  0x44   : > { %p567_p6 = scmp.lt.u32.totalorder %s558_s8, %s848_s12 }
  0x45   : > { %p562_p9 = pneg %p561_p7  ;;  %p566_p4 = por %p565_p2, %p564_p1 }
  0x47   : > { %p568_p8 = por %p567_p6, %p566_p4 }
  0x49   : > { %p569_p10 = pnand %p568_p8, %p562_p9 }
  0x4b   : > { %572 = shalt.err (!%p569_p10)
}
  0x4c   : > { %s573_s7 = scalar_lea.vmem %s843_s21, 128  ;;  %s695_s10 = smov [#allocation2]  }
  0x4d   : > { %p574_p12 = scmp.ne.s32.totalorder %s843_s21, %s573_s7  ;;  %s578_s11 = sshll.u32 %s695_s10, 4  ;;  %s579_s11 = int_to_ptr.vmem [resolvable:$false] %s578_s11 }
  0x4e   : > { %s580_s23 = scalar_lea.vmem %s579_s11, 256  ;;  %p581_p7 = scmp.lt.s32.totalorder %s843_s21, %s579_s11 }
  0x4f   : > { %p576_p13 = pnand %p574_p12, %p560_p5  ;;  %p582_p1 = scmp.lt.s32.totalorder %s580_s23, %s573_s7 }
  0x51   : > { %p577_p3 = pneg %p576_p13  ;;  %p583_p2 = por %p582_p1, %p581_p7 }
  0x53   : > { %p584_p4 = pnand %p583_p2, %p577_p3 }
  0x55   : > { %587 = shalt.err (!%p584_p4)
}
  0x56   : > { %450 = dma.hbm_to_vmem [thread:$0]  (!%p854_p0), %s848_s12, 128, %s843_s21, %s165_s5  }
  0x57   : > { %p987_p9 = scmp.ne.s32.totalorder %s979_s26, 0 }
  0x58   : > { %s886_s20 = sand.u32 (!%p987_p9), 1, %s666_s13   ;;  %p988_p5 = scmp.ne.s32.totalorder (!%p987_p9), %s976_s24, 0 }
  0x59   : > { %186 = sbr.rel (%p987_p9) target bundleno = 339 (0x153), region = 32  ;;  %s412_s8 = sshll.u32 (!%p987_p9), %s886_s20, 3 }
  0x5a   : > { %s189_s1 = scalar_lea.sflag (!%p987_p9), [#allocation3], %s886_s20  ;;  %s192_s25 = scalar_lea.vmem (!%p987_p9), [#allocation2], %s412_s8 }
  0x60   : > { %649 = dma.done.wait (%p988_p5), %s189_s1, 128  }
  0x61   : > { %651 = vsyncadd (%p988_p5), %s189_s1, 4294967168  ;;  %p989_p6 = scmp.ne.s32.totalorder %s974_s22, 0 }
  0x63   : > { %653 = dma.done.wait (%p989_p6), [#allocation6], 256  }
  0x64   : > { %655 = vsyncadd (%p989_p6), [#allocation6], 4294967040  ;;  %v696_v0 = vmov 0.0   ;;  %vm697_vm0 = vmmov 0   ;;  %v528_v1 = vld [vmem:[#allocation5] sm:$0xff]   ;;  %v529_v2 = vld [vmem:[#allocation5 + $0x8] sm:$0xff]  }
  0x65   : > { %427 = vmatprep.subr.bf16.mxu0 %v696_v0  ;;  %431 = vmatprep.mubr.msk.bf16.mxu0 %vm697_vm0, %v696_v0  ;;  %v220_v3 = vld [vmem:[%s192_s25] sm:$0xff]  ;;  %vm245_vm1 = vcmask 261120   ;;  %s414_s12 = sshll.u32 %s886_s20, 2  ;;  %s420_s24 = sshll.u32 %s678_s16, 1  ;;  %vm290_vm2 = vcmask 781312  }
  0x66   : > { %428 = vmatpush3.bf16.msra.mxu0 %v528_v1  ;;  %v221_v4 = vpack.c.bf16 %v220_v3, %v220_v3  ;;  %s304_s22 = sadd.s32 %s674_s15, %s420_s24  ;;  %v415_v5 = vld [vmem:[%s963_s2] ss:$0 sm:$0xff]  ;;  %s218_s5 = scalar_lea.vmem [#allocation7], %s414_s12 }
  0x67   : > { %429 = vmatprep.subr.bf16.mxu0 %v696_v0  ;;  %s421_s6 = sshll.u32 %s304_s22, 6  ;;  %s308_s30 = sshll.u32 %s218_s5, 4  ;;  %s909_s30 = int_to_ptr.vmem [resolvable:$true] %s308_s30 }
  0x68   : > { %s907_s16 = scalar_lea.hbm %s964_s3, %s421_s6  ;;  %s293_s15 = scalar_lea.sflag [#allocation4], %s886_s20 }
  0x69   : > { %s588_s7 = scalar_lea.vmem %s909_s30, 64  ;;  %s698_s10 = smov [#allocation7]  }
  0x6a   : > { %430 = vmatpush3.bf16.msra.mxu0 %v529_v2  ;;  %p589_p0 = scmp.ne.s32.totalorder %s909_s30, %s588_s7  ;;  %s592_s11 = sshll.u32 %s698_s10, 4  ;;  %s593_s11 = int_to_ptr.vmem [resolvable:$false] %s592_s11 }
  0x6b   : > { %s594_s23 = scalar_lea.vmem %s593_s11, 128  ;;  %p595_p12 = scmp.lt.s32.totalorder %s909_s30, %s593_s11 }
  0x6c   : > { %p590_p8 = pnand %p589_p0, %p824_p11  ;;  %p596_p13 = scmp.lt.s32.totalorder %s594_s23, %s588_s7 }
  0x6d   : > { %432 = vmatmul.mubr.msk.bf16.vlgmr.msra.gmra.mrb[0].mxu0 %vm245_vm1, %v221_v4 }
  0x6e   : > { %p591_p10 = pneg %p590_p8  ;;  %p597_p3 = por %p596_p13, %p595_p12 }
  0x70   : > { %p598_p7 = pnand %p597_p3, %p591_p10 }
 0x140   : > { %v283_v6 = vpop.f32.mrb[0].mxu0 }
 0x141   : > { %v284_v7 = vadd.f32 %v415_v5, %v283_v6  ;;  %v433_v8 = vpop.f32.mrb[1].mxu0 }
 0x142   : > { %v286_v9 = vpop.f32.mrb[2].mxu0 }
 0x143   : > { %v289_v10 = vpack.c.bf16 %v284_v7, %v284_v7  ;;  %v434_v11 = vpop.f32.mrb[3].mxu0 }
 0x145   : > { %291 = vst.msk [vmem:[%s218_s5] sm:$0xf] %vm290_vm2, %v289_v10 }
 0x146   : > { %601 = shalt.err (!%p598_p7)
}
 0x147   : > { %s602_s20 = scalar_lea.hbm %s907_s16, 64  ;;  %s606_s25 = scalar_lea.hbm %s964_s3, 256 }
 0x148   : > { %p603_p1 = scmp.ne.s32.totalorder %s907_s16, %s602_s20  ;;  %p607_p9 = scmp.lt.u32.totalorder %s907_s16, %s964_s3 }
 0x149   : > { %p608_p5 = scmp.lt.u32.totalorder %s606_s25, %s602_s20  ;;  %p610_p0 = scmp.lt.u32.totalorder %s602_s20, %s907_s16 }
 0x14a   : > { %p604_p2 = pnand %p603_p1, %p824_p11 }
 0x14b   : > { %p609_p6 = por %p608_p5, %p607_p9 }
 0x14c   : > { %p605_p4 = pneg %p604_p2 }
 0x14d   : > { %p611_p8 = por %p610_p0, %p609_p6 }
 0x14f   : > { %p612_p10 = pnand %p611_p8, %p605_p4 }
 0x151   : > { %615 = shalt.err (!%p612_p10)
}
 0x152   : > { %441 = dma.vmem_to_hbm [thread:$0]  (%p824_p11), %s909_s30, 64, %s907_s16, %s293_s15  }
 0x153 PF: > { %s990_s22 = sld [smem:[#allocation11_spill]]  ;;  %s991_s26 = sld [smem:[#allocation12_spill]] }
 0x154   : > { %p458_p12 = scmp.ge.s32.totalorder %s690_s19, 2 }
 0x159   : > { %s320_s21 = sand.u32 1, %s990_s22   ;;  %p992_p13 = scmp.ne.s32.totalorder %s991_s26, 0 }
 0x15a   : > { %s321_s6 = scalar_lea.sflag [#allocation4], %s320_s21 }
 0x15b   : > { %p452_p3 = pnand %p458_p12, %p992_p13 }
 0x15d   : > { %657 = dma.done.wait (!%p452_p3), %s321_s6, 64  }
 0x15e   : > { %659 = vsyncadd (!%p452_p3), %s321_s6, 4294967232  ;;  %s20_s19 = sadd.s32 1, %s690_s19   ;;  %s993_s29 = sld [smem:[#allocation13_spill]] }
 0x15f   : > { %p17_p7 = scmp.ge.s32.totalorder %s20_s19, 6   ;;  %s994_s12 = smov %s666_s13 }
 0x160   : > { %s995_s13 = smov %s670_s14  ;;  %s996_s14 = smov %s841_s27 }
 0x161   : > { %s997_s15 = smov %s682_s17  ;;  %s998_s16 = smov %s686_s18 }
 0x162   : > { %s1000_s18 = smov %s1006_s4  ;;  %19 = sbr.rel (!%p17_p7) target bundleno = 10 (0xa), region = 81 }
 0x164   : > { %s999_s17 = smov %s993_s29 }
 0x169   :  { %326 = vsyncpa [#allocation3], 1 }
 0x16a   :  { %328 = vsyncpa [#allocation3 + $0x1], 1 }
 0x16b   :  { %329 = vsyncpa [#allocation6], 1 }
 0x16c   :  { %330 = vsyncpa [#allocation4], 1 }
 0x16d   :  { %332 = vsyncpa [#allocation4 + $0x1], 1 }

</bundles_post_ra>
